<compile_context>
chip_gen: v5e
topology: v5e:2x2
jax: 0.10.0
libtpu: 0.0.40
codegen_flags: <defaults>
</compile_context>

<pallas_src>
import functools

import jax
import jax.numpy as jnp
from jax.experimental import pallas as pl
from jax.experimental.pallas import tpu as pltpu


def _round_up(x, m):
    return (x + m - 1) // m * m


# ----------------------------- Pallas kernel ------------------------------ #
def _gcn_layer_kernel(a_ref, x_ref, w_ref, b_ref, o_ref, acc_ref, *, apply_relu):
    """One GCNConv layer, K-tiled:  o = [relu]((sum_k A_blk @ X_blk) @ W + b)."""
    k = pl.program_id(1)

    @pl.when(k == 0)
    def _():
        acc_ref[...] = jnp.zeros_like(acc_ref)

    # f32 accumulation of the aggregation matmul (A bf16, X bf16 -> MXU).
    acc_ref[...] += jnp.dot(a_ref[...], x_ref[...],
                            preferred_element_type=jnp.float32)

    @pl.when(k == pl.num_programs(1) - 1)
    def _():
        # Feature transform + bias + activation epilogue (f32 math).
        h = jnp.dot(acc_ref[...].astype(jnp.bfloat16), w_ref[...],
                    preferred_element_type=jnp.float32)
        h = h + b_ref[...]
        if apply_relu:
            h = jnp.maximum(h, 0.0)
        o_ref[...] = h.astype(o_ref.dtype)


# --------------------------- tiling / VMEM math ---------------------------- #
def _vmem_budget():
    """Generation-aware budgets: ~65% of per-core VMEM for tile accounting,
    ~80% as the scoped limit (v7x: 64 MiB -> ~41/51 MiB; v5e/v6e: 128 MiB ->
    ~83/102 MiB).  Falls back to a v7x-safe 64 MiB capacity if unknown."""
    cap = 64 * 1024 * 1024
    try:
        info = pltpu.get_tpu_info()
        cap = int(getattr(info, "vmem_capacity_bytes", cap))
    except Exception:
        pass
    budget = int(cap * 0.65)
    limit = min(int(cap * 0.80), 110 * 1024 * 1024)
    return budget, limit


def _pick_tiles(npad, fin_p, fout_p, out_itemsize, budget_bytes):
    """Pick (tn, tk): multiples of 128 dividing npad, largest A-block DMA that
    fits the VMEM budget, with tn capped so the parallel row axis has >= 2
    steps (megacore) and stays in the 512-2048 DMA sweet spot."""
    m = npad // 128
    divisors = [d * 128 for d in range(1, m + 1) if m % d == 0]

    tn_cap = 128 if npad <= 128 else min(npad // 2, 2048)
    row_cands = [t for t in divisors if t <= tn_cap] or [128]

    def vmem_bytes(tn, tk):
        a_blk = 2 * tn * tk * 2                 # A block, double-buffered bf16
        x_blk = 2 * tk * fin_p * 2              # X block, double-buffered bf16
        w_blk = 2 * fin_p * fout_p * 2          # W (constant block, still 2x)
        b_blk = 2 * 8 * fout_p * 4              # bias, (1,F) pads to 8 sublanes
        o_blk = 2 * tn * fout_p * out_itemsize  # output block, double-buffered
        acc = tn * fin_p * 4                    # f32 accumulator scratch
        return a_blk + x_blk + w_blk + b_blk + o_blk + acc

    for tn in sorted(row_cands, reverse=True):
        for tk in sorted(divisors, reverse=True):
            if vmem_bytes(tn, tk) <= budget_bytes:
                return tn, tk
    return 128, 128


# ------------------------------ layer launcher ----------------------------- #
def _gcn_layer(a_p, x_p, w_p, b_p, *, apply_relu, out_dtype):
    npad = a_p.shape[0]
    fin = x_p.shape[1]
    fout = w_p.shape[1]
    out_itemsize = jnp.dtype(out_dtype).itemsize

    budget, vmem_limit = _vmem_budget()
    tn, tk = _pick_tiles(npad, fin, fout, out_itemsize, budget)
    grid = (npad // tn, npad // tk)

    flops = 2 * (npad * npad * fin + npad * fin * fout)
    bytes_accessed = (
        a_p.size * a_p.dtype.itemsize                       # A streamed once
        + grid[0] * x_p.size * x_p.dtype.itemsize           # X re-read per row blk
        + w_p.size * w_p.dtype.itemsize
        + b_p.size * b_p.dtype.itemsize
        + npad * fout * out_itemsize)

    kernel = functools.partial(_gcn_layer_kernel, apply_relu=apply_relu)
    return pl.pallas_call(
        kernel,
        out_shape=jax.ShapeDtypeStruct((npad, fout), out_dtype),
        grid_spec=pltpu.PrefetchScalarGridSpec(
            num_scalar_prefetch=0,
            grid=grid,
            in_specs=[
                pl.BlockSpec((tn, tk), lambda i, k: (i, k)),      # A block
                pl.BlockSpec((tk, fin), lambda i, k: (k, 0)),     # X K-block
                pl.BlockSpec((fin, fout), lambda i, k: (0, 0)),   # W (constant)
                pl.BlockSpec((1, fout), lambda i, k: (0, 0)),     # bias (const)
            ],
            out_specs=pl.BlockSpec((tn, fout), lambda i, k: (i, 0)),
            scratch_shapes=[pltpu.VMEM((tn, fin), jnp.float32)],  # A@X accum
        ),
        compiler_params=pltpu.CompilerParams(
            dimension_semantics=("parallel", "arbitrary"),
            vmem_limit_bytes=vmem_limit,
        ),
        cost_estimate=pl.CostEstimate(
            flops=flops, transcendentals=0, bytes_accessed=int(bytes_accessed)),
    )(a_p, x_p, w_p, b_p)


# ------------------------------- wrapper ----------------------------------- #
def gcn_forward(a_p, x, w1, b1, w2, b2, n):
    """out = A_hat @ relu(A_hat @ X @ W1 + b1) @ W2 + b2.

    `a_p` is the already-padded (npad, npad) bf16 normalized adjacency."""
    npad = a_p.shape[0]
    fin, hid = w1.shape
    out = w2.shape[1]

    fin_p = _round_up(fin, 128)
    hid_p = _round_up(hid, 128)
    out_p = _round_up(out, 128)

    # Lane-dense, zero-padded operands.  Weights pre-cast to bf16 (halves W
    # DMA, no in-kernel cast); biases stay f32 for the f32 epilogue.
    x_p = jnp.zeros((npad, fin_p), jnp.bfloat16).at[:n, :fin].set(
        x.astype(jnp.bfloat16))
    w1_p = jnp.zeros((fin_p, hid_p), jnp.bfloat16).at[:fin, :hid].set(
        w1.astype(jnp.bfloat16))
    b1_p = jnp.zeros((1, hid_p), jnp.float32).at[:, :hid].set(b1)
    w2_p = jnp.zeros((hid_p, out_p), jnp.bfloat16).at[:hid, :out].set(
        w2.astype(jnp.bfloat16))
    b2_p = jnp.zeros((1, out_p), jnp.float32).at[:, :out].set(b2)

    # Layer 1 (fused ReLU); hidden kept bf16 in HBM to halve the H round trip.
    h_p = _gcn_layer(a_p, x_p, w1_p, b1_p, apply_relu=True,
                     out_dtype=jnp.bfloat16)
    # Layer 2.
    o_p = _gcn_layer(a_p, h_p, w2_p, b2_p, apply_relu=False,
                     out_dtype=jnp.float32)
    return o_p[:n, :out]


# ------------------------------- JAX glue ---------------------------------- #
def build_normalized_adjacency(edge_index, num_nodes, num_nodes_padded=None,
                               dtype=jnp.float32):
    """Dense A_hat = D^{-1/2} (A + I) D^{-1/2} (gcn_norm defaults), scattered
    directly into the padded buffer and cast once to the kernel dtype."""
    # TODO(synk): the edge_index scatter-add has no clean tiled Pallas
    # equivalent at this size; it stays in plain JAX inside the same jit.
    npad = num_nodes if num_nodes_padded is None else num_nodes_padded
    src, dst = edge_index[0], edge_index[1]
    loop = jnp.arange(num_nodes, dtype=edge_index.dtype)
    src = jnp.concatenate([src, loop])
    dst = jnp.concatenate([dst, loop])
    ew = jnp.ones(src.shape[0], dtype=jnp.float32)
    deg = jnp.zeros(num_nodes, jnp.float32).at[dst].add(ew)
    deg_inv_sqrt = jnp.where(deg > 0, jax.lax.rsqrt(deg), 0.0)
    norm = deg_inv_sqrt[src] * ew * deg_inv_sqrt[dst]
    a_hat = jnp.zeros((npad, npad), jnp.float32).at[dst, src].add(norm)
    return a_hat.astype(dtype)


def gcn_reference(a_hat, x, w1, b1, w2, b2):
    h = a_hat @ (x @ w1) + b1
    h = jnp.maximum(h, 0.0)
    return a_hat @ (h @ w2) + b2


# --------------------------------- main ------------------------------------ #
if __name__ == "__main__":
    num_nodes = 64
    num_edges = 128
    input_dim, hidden_dim, output_dim = 16, 32, 8
    npad = _round_up(max(num_nodes, 128), 128)

    key = jax.random.PRNGKey(0)
    kx, ke1, ke2, kw1, kw2, kb1, kb2 = jax.random.split(key, 7)

    x = jax.random.normal(kx, (num_nodes, input_dim), jnp.float32)
    src = jax.random.randint(ke1, (num_edges,), 0, num_nodes, jnp.int32)
    dst = jax.random.randint(ke2, (num_edges,), 0, num_nodes, jnp.int32)
    edge_index = jnp.stack([src, dst], axis=0)

    def glorot(k, fan_in, fan_out):
        limit = (6.0 / (fan_in + fan_out)) ** 0.5
        return jax.random.uniform(k, (fan_in, fan_out), jnp.float32, -limit, limit)

    w1 = glorot(kw1, input_dim, hidden_dim)
    b1 = 0.1 * jax.random.normal(kb1, (1, hidden_dim), jnp.float32)
    w2 = glorot(kw2, hidden_dim, output_dim)
    b2 = 0.1 * jax.random.normal(kb2, (1, output_dim), jnp.float32)

    @jax.jit
    def run(edge_index, x, w1, b1, w2, b2):
        a_p = build_normalized_adjacency(edge_index, num_nodes, npad,
                                         dtype=jnp.bfloat16)
        return gcn_forward(a_p, x, w1, b1, w2, b2, num_nodes)

    out = jax.block_until_ready(run(edge_index, x, w1, b1, w2, b2))

    a_ref = build_normalized_adjacency(edge_index, num_nodes)[:num_nodes, :num_nodes]
    ref = gcn_reference(a_ref, x, w1, b1, w2, b2)

    assert out.shape == (num_nodes, output_dim)
    rel_err = float(jnp.linalg.norm(out - ref) / (jnp.linalg.norm(ref) + 1e-12))
    assert rel_err < 2e-2, f"mismatch vs reference, rel_err={rel_err:.4f}"

    print("KERNEL_OK")
</pallas_src>

<mosaic_0001>
module attributes {stable_mosaic.version = 11 : i64} {
  func.func @_gcn_layer_kernel(%arg0: i32, %arg1: i32, %arg2: memref<128x128xbf16, #tpu.memory_space<vmem>>, %arg3: memref<128x128xbf16, #tpu.memory_space<vmem>>, %arg4: memref<128x128xbf16, #tpu.memory_space<vmem>>, %arg5: memref<1x128xf32, #tpu.memory_space<vmem>>, %arg6: memref<128x128xbf16, #tpu.memory_space<vmem>>, %arg7: memref<128x128xf32, #tpu.memory_space<vmem>>) attributes {dimension_semantics = [#tpu.dimension_semantics<parallel>, #tpu.dimension_semantics<arbitrary>], iteration_bounds = array<i64: 1, 1>, scalar_prefetch = 0 : i64, scratch_operands = 1 : i64, tpu.core_type = #tpu.core_type<tc>, window_params = [{transform_indices = @transform_0, window_bounds = array<i64: 128, 128>}, {transform_indices = @transform_1, window_bounds = array<i64: 128, 128>}, {pipeline_mode = #tpu.pipeline_mode<synchronous>, transform_indices = @transform_2, window_bounds = array<i64: 128, 128>}, {pipeline_mode = #tpu.pipeline_mode<synchronous>, transform_indices = @transform_3, window_bounds = array<i64: 1, 128>}, {transform_indices = @transform_4, window_bounds = array<i64: 128, 128>}]} {
    %c0_i32 = arith.constant 0 : i32
    %0 = arith.cmpi eq, %arg1, %c0_i32 : i32
    %1 = arith.extui %0 : i1 to i32
    %c0_i32_0 = arith.constant 0 : i32
    %2 = arith.cmpi ne, %1, %c0_i32_0 : i32
    scf.if %2 {
      %cst_10 = arith.constant 0.000000e+00 : f32
      %12 = vector.broadcast %cst_10 : f32 to vector<128x128xf32>
      %c0_11 = arith.constant 0 : index
      %c0_12 = arith.constant 0 : index
      %13 = vector.load %arg7[%c0_11, %c0_12] : memref<128x128xf32, #tpu.memory_space<vmem>>, vector<128x128xf32>
      tpu.vector_store %arg7[%c0_11, %c0_12], %12 {strides = array<i32>} : memref<128x128xf32, #tpu.memory_space<vmem>>, vector<128x128xf32>,
    } else {
    }
    %c0 = arith.constant 0 : index
    %c0_1 = arith.constant 0 : index
    %3 = vector.load %arg7[%c0, %c0_1] : memref<128x128xf32, #tpu.memory_space<vmem>>, vector<128x128xf32>
    %c0_2 = arith.constant 0 : index
    %c0_3 = arith.constant 0 : index
    %4 = vector.load %arg2[%c0_2, %c0_3] : memref<128x128xbf16, #tpu.memory_space<vmem>>, vector<128x128xbf16>
    %c0_4 = arith.constant 0 : index
    %c0_5 = arith.constant 0 : index
    %5 = vector.load %arg3[%c0_4, %c0_5] : memref<128x128xbf16, #tpu.memory_space<vmem>>, vector<128x128xbf16>
    %cst = arith.constant dense<0.000000e+00> : vector<128x128xf32>
    %6 = tpu.matmul %4, %5, %cst {dimension_numbers = #tpu.dot_dimension_numbers<[1], [0], [0], [1], [0, 0, 1, 1], [], []>} : vector<128x128xbf16>, vector<128x128xbf16>, vector<128x128xf32> -> vector<128x128xf32>
    %7 = arith.addf %3, %6 : vector<128x128xf32>
    %c0_6 = arith.constant 0 : index
    %c0_7 = arith.constant 0 : index
    %8 = vector.load %arg7[%c0_6, %c0_7] : memref<128x128xf32, #tpu.memory_space<vmem>>, vector<128x128xf32>
    tpu.vector_store %arg7[%c0_6, %c0_7], %7 {strides = array<i32>} : memref<128x128xf32, #tpu.memory_space<vmem>>, vector<128x128xf32>,
    %c0_i32_8 = arith.constant 0 : i32
    %9 = arith.cmpi eq, %arg1, %c0_i32_8 : i32
    %10 = arith.extui %9 : i1 to i32
    %c0_i32_9 = arith.constant 0 : i32
    %11 = arith.cmpi ne, %10, %c0_i32_9 : i32
    scf.if %11 {
      %c0_10 = arith.constant 0 : index
      %c0_11 = arith.constant 0 : index
      %12 = vector.load %arg7[%c0_10, %c0_11] : memref<128x128xf32, #tpu.memory_space<vmem>>, vector<128x128xf32>
      %13 = arith.truncf %12 : vector<128x128xf32> to vector<128x128xbf16>
      %c0_12 = arith.constant 0 : index
      %c0_13 = arith.constant 0 : index
      %14 = vector.load %arg4[%c0_12, %c0_13] : memref<128x128xbf16, #tpu.memory_space<vmem>>, vector<128x128xbf16>
      %cst_14 = arith.constant dense<0.000000e+00> : vector<128x128xf32>
      %15 = tpu.matmul %13, %14, %cst_14 {dimension_numbers = #tpu.dot_dimension_numbers<[1], [0], [0], [1], [0, 0, 1, 1], [], []>} : vector<128x128xbf16>, vector<128x128xbf16>, vector<128x128xf32> -> vector<128x128xf32>
      %c0_15 = arith.constant 0 : index
      %c0_16 = arith.constant 0 : index
      %16 = vector.load %arg5[%c0_15, %c0_16] : memref<1x128xf32, #tpu.memory_space<vmem>>, vector<1x128xf32>
      %17 = vector.broadcast %16 : vector<1x128xf32> to vector<128x128xf32>
      %18 = arith.addf %15, %17 : vector<128x128xf32>
      %cst_17 = arith.constant 0.000000e+00 : f32
      %19 = vector.broadcast %cst_17 : f32 to vector<128x128xf32>
      %20 = arith.maximumf %18, %19 : vector<128x128xf32>
      %21 = arith.truncf %20 : vector<128x128xf32> to vector<128x128xbf16>
      %c0_18 = arith.constant 0 : index
      %c0_19 = arith.constant 0 : index
      %22 = vector.load %arg6[%c0_18, %c0_19] : memref<128x128xbf16, #tpu.memory_space<vmem>>, vector<128x128xbf16>
      tpu.vector_store %arg6[%c0_18, %c0_19], %21 {strides = array<i32>} : memref<128x128xbf16, #tpu.memory_space<vmem>>, vector<128x128xbf16>,
    } else {
    }
    return
  }
  func.func @transform_0(%arg0: i32, %arg1: i32) -> (i32, i32) {
    %c0_i32 = arith.constant 0 : i32
    return %arg0, %arg1 : i32, i32
  }
  func.func @transform_1(%arg0: i32, %arg1: i32) -> (i32, i32) {
    %c0_i32 = arith.constant 0 : i32
    %c0_i32_0 = arith.constant 0 : i32
    return %arg1, %c0_i32 : i32, i32
  }
  func.func @transform_2(%arg0: i32, %arg1: i32) -> (i32, i32) {
    %c0_i32 = arith.constant 0 : i32
    %c0_i32_0 = arith.constant 0 : i32
    %c0_i32_1 = arith.constant 0 : i32
    return %c0_i32, %c0_i32_0 : i32, i32
  }
  func.func @transform_3(%arg0: i32, %arg1: i32) -> (i32, i32) {
    %c0_i32 = arith.constant 0 : i32
    %c0_i32_0 = arith.constant 0 : i32
    %c0_i32_1 = arith.constant 0 : i32
    return %c0_i32, %c0_i32_0 : i32, i32
  }
  func.func @transform_4(%arg0: i32, %arg1: i32) -> (i32, i32) {
    %c0_i32 = arith.constant 0 : i32
    %c0_i32_0 = arith.constant 0 : i32
    return %arg0, %c0_i32 : i32, i32
  }
}

module attributes {stable_mosaic.version = 11 : i64} {
  func.func @_gcn_layer_kernel(%arg0: i32, %arg1: i32, %arg2: memref<128x128xbf16, #tpu.memory_space<vmem>>, %arg3: memref<128x128xbf16, #tpu.memory_space<vmem>>, %arg4: memref<128x128xbf16, #tpu.memory_space<vmem>>, %arg5: memref<1x128xf32, #tpu.memory_space<vmem>>, %arg6: memref<128x128xf32, #tpu.memory_space<vmem>>, %arg7: memref<128x128xf32, #tpu.memory_space<vmem>>) attributes {dimension_semantics = [#tpu.dimension_semantics<parallel>, #tpu.dimension_semantics<arbitrary>], iteration_bounds = array<i64: 1, 1>, scalar_prefetch = 0 : i64, scratch_operands = 1 : i64, tpu.core_type = #tpu.core_type<tc>, window_params = [{transform_indices = @transform_0, window_bounds = array<i64: 128, 128>}, {transform_indices = @transform_1, window_bounds = array<i64: 128, 128>}, {pipeline_mode = #tpu.pipeline_mode<synchronous>, transform_indices = @transform_2, window_bounds = array<i64: 128, 128>}, {pipeline_mode = #tpu.pipeline_mode<synchronous>, transform_indices = @transform_3, window_bounds = array<i64: 1, 128>}, {transform_indices = @transform_4, window_bounds = array<i64: 128, 128>}]} {
    %c0_i32 = arith.constant 0 : i32
    %0 = arith.cmpi eq, %arg1, %c0_i32 : i32
    %1 = arith.extui %0 : i1 to i32
    %c0_i32_0 = arith.constant 0 : i32
    %2 = arith.cmpi ne, %1, %c0_i32_0 : i32
    scf.if %2 {
      %cst_10 = arith.constant 0.000000e+00 : f32
      %12 = vector.broadcast %cst_10 : f32 to vector<128x128xf32>
      %c0_11 = arith.constant 0 : index
      %c0_12 = arith.constant 0 : index
      %13 = vector.load %arg7[%c0_11, %c0_12] : memref<128x128xf32, #tpu.memory_space<vmem>>, vector<128x128xf32>
      tpu.vector_store %arg7[%c0_11, %c0_12], %12 {strides = array<i32>} : memref<128x128xf32, #tpu.memory_space<vmem>>, vector<128x128xf32>,
    } else {
    }
    %c0 = arith.constant 0 : index
    %c0_1 = arith.constant 0 : index
    %3 = vector.load %arg7[%c0, %c0_1] : memref<128x128xf32, #tpu.memory_space<vmem>>, vector<128x128xf32>
    %c0_2 = arith.constant 0 : index
    %c0_3 = arith.constant 0 : index
    %4 = vector.load %arg2[%c0_2, %c0_3] : memref<128x128xbf16, #tpu.memory_space<vmem>>, vector<128x128xbf16>
    %c0_4 = arith.constant 0 : index
    %c0_5 = arith.constant 0 : index
    %5 = vector.load %arg3[%c0_4, %c0_5] : memref<128x128xbf16, #tpu.memory_space<vmem>>, vector<128x128xbf16>
    %cst = arith.constant dense<0.000000e+00> : vector<128x128xf32>
    %6 = tpu.matmul %4, %5, %cst {dimension_numbers = #tpu.dot_dimension_numbers<[1], [0], [0], [1], [0, 0, 1, 1], [], []>} : vector<128x128xbf16>, vector<128x128xbf16>, vector<128x128xf32> -> vector<128x128xf32>
    %7 = arith.addf %3, %6 : vector<128x128xf32>
    %c0_6 = arith.constant 0 : index
    %c0_7 = arith.constant 0 : index
    %8 = vector.load %arg7[%c0_6, %c0_7] : memref<128x128xf32, #tpu.memory_space<vmem>>, vector<128x128xf32>
    tpu.vector_store %arg7[%c0_6, %c0_7], %7 {strides = array<i32>} : memref<128x128xf32, #tpu.memory_space<vmem>>, vector<128x128xf32>,
    %c0_i32_8 = arith.constant 0 : i32
    %9 = arith.cmpi eq, %arg1, %c0_i32_8 : i32
    %10 = arith.extui %9 : i1 to i32
    %c0_i32_9 = arith.constant 0 : i32
    %11 = arith.cmpi ne, %10, %c0_i32_9 : i32
    scf.if %11 {
      %c0_10 = arith.constant 0 : index
      %c0_11 = arith.constant 0 : index
      %12 = vector.load %arg7[%c0_10, %c0_11] : memref<128x128xf32, #tpu.memory_space<vmem>>, vector<128x128xf32>
      %13 = arith.truncf %12 : vector<128x128xf32> to vector<128x128xbf16>
      %c0_12 = arith.constant 0 : index
      %c0_13 = arith.constant 0 : index
      %14 = vector.load %arg4[%c0_12, %c0_13] : memref<128x128xbf16, #tpu.memory_space<vmem>>, vector<128x128xbf16>
      %cst_14 = arith.constant dense<0.000000e+00> : vector<128x128xf32>
      %15 = tpu.matmul %13, %14, %cst_14 {dimension_numbers = #tpu.dot_dimension_numbers<[1], [0], [0], [1], [0, 0, 1, 1], [], []>} : vector<128x128xbf16>, vector<128x128xbf16>, vector<128x128xf32> -> vector<128x128xf32>
      %c0_15 = arith.constant 0 : index
      %c0_16 = arith.constant 0 : index
      %16 = vector.load %arg5[%c0_15, %c0_16] : memref<1x128xf32, #tpu.memory_space<vmem>>, vector<1x128xf32>
      %17 = vector.broadcast %16 : vector<1x128xf32> to vector<128x128xf32>
      %18 = arith.addf %15, %17 : vector<128x128xf32>
      %c0_17 = arith.constant 0 : index
      %c0_18 = arith.constant 0 : index
      %19 = vector.load %arg6[%c0_17, %c0_18] : memref<128x128xf32, #tpu.memory_space<vmem>>, vector<128x128xf32>
      tpu.vector_store %arg6[%c0_17, %c0_18], %18 {strides = array<i32>} : memref<128x128xf32, #tpu.memory_space<vmem>>, vector<128x128xf32>,
    } else {
    }
    return
  }
  func.func @transform_0(%arg0: i32, %arg1: i32) -> (i32, i32) {
    %c0_i32 = arith.constant 0 : i32
    return %arg0, %arg1 : i32, i32
  }
  func.func @transform_1(%arg0: i32, %arg1: i32) -> (i32, i32) {
    %c0_i32 = arith.constant 0 : i32
    %c0_i32_0 = arith.constant 0 : i32
    return %arg1, %c0_i32 : i32, i32
  }
  func.func @transform_2(%arg0: i32, %arg1: i32) -> (i32, i32) {
    %c0_i32 = arith.constant 0 : i32
    %c0_i32_0 = arith.constant 0 : i32
    %c0_i32_1 = arith.constant 0 : i32
    return %c0_i32, %c0_i32_0 : i32, i32
  }
  func.func @transform_3(%arg0: i32, %arg1: i32) -> (i32, i32) {
    %c0_i32 = arith.constant 0 : i32
    %c0_i32_0 = arith.constant 0 : i32
    %c0_i32_1 = arith.constant 0 : i32
    return %c0_i32, %c0_i32_0 : i32, i32
  }
  func.func @transform_4(%arg0: i32, %arg1: i32) -> (i32, i32) {
    %c0_i32 = arith.constant 0 : i32
    %c0_i32_0 = arith.constant 0 : i32
    return %arg0, %c0_i32 : i32, i32
  }
}

</mosaic_0001>

<bundles_post_ra>
// kernel: mul.1
= control target key start
LH: loop header
LB: loop body
LE: loop exit
PB: predicated region body
PF: predicated region fallthrough
CT: control target
= control target key end

     0   :  { %s34_s0 = inlined_call_operand.vmem [shape: f32[192], index: 0, kind: input, shape index: {}]   ;;  %s35_s1 = inlined_call_operand.vmem [shape: f32[192], index: 1, kind: input, shape index: {}]   ;;  %s36_s2 = inlined_call_operand.vmem [shape: f32[192], index: 2, kind: output, shape index: {}]  }
   0x1   :  { %v3_v0 = vld [vmem:[%s34_s0] sm:$0x3] }
   0x2   :  { %v4_v1 = vld [vmem:[%s35_s1] sm:$0x3] }
   0x3   :  { %v7_v2 = vmul.f32 %v4_v1, %v3_v0 }
   0x5   :  { %9 = vst [vmem:[%s36_s2] sm:$0x3] %v7_v2 }

// kernel: run.2
= control target key start
LH: loop header
LB: loop body
LE: loop exit
PB: predicated region body
PF: predicated region fallthrough
CT: control target
= control target key end

     0   :  { %s766_s1 = inlined_call_operand.vmem [shape: bf16[128,128], index: 1, kind: input, shape index: {}]   ;;  %s767_s0 = inlined_call_operand.vmem [shape: bf16[128,128], index: 0, kind: input, shape index: {}]   ;;  %s768_s2 = inlined_call_operand.vmem [shape: bf16[128,128], index: 2, kind: input, shape index: {}]   ;;  %s769_s3 = inlined_call_operand.vmem [shape: f32[1,128], index: 3, kind: input, shape index: {}]   ;;  %s770_s4 = inlined_call_operand.vmem [shape: bf16[128,128], index: 4, kind: output, shape index: {}]  }
   0x1   :  { %v569_v0 = vld [vmem:[%s766_s1 + $0x38] sm:$0xff]  ;;  %v568_v1 = vld [vmem:[%s766_s1 + $0x30] sm:$0xff]  ;;  %v567_v2 = vld [vmem:[%s766_s1 + $0x28] sm:$0xff] }
   0x2   :  { %181 = vmatpush.bf16.msra.mxu0 %v569_v0  ;;  %625 = vmatpush.bf16.msra.mxu2 %v569_v0  ;;  %v566_v3 = vld [vmem:[%s766_s1 + $0x20] sm:$0xff]  ;;  %v565_v4 = vld [vmem:[%s766_s1 + $0x18] sm:$0xff]  ;;  %v564_v5 = vld [vmem:[%s766_s1 + $0x10] sm:$0xff] }
   0x3   :  { %v563_v6 = vld [vmem:[%s766_s1 + $0x8] sm:$0xff]  ;;  %v562_v7 = vld [vmem:[%s766_s1] sm:$0xff]  ;;  %v577_v12 = vld [vmem:[%s768_s2 + $0x38] sm:$0xff] }
   0x4   :  { %v554_v8 = vld [vmem:[%s767_s0] sm:$0xff]  ;;  %v555_v10 = vld [vmem:[%s767_s0 + $0x8] sm:$0xff]  ;;  %357 = vmatpush.bf16.msra.mxu1 %v577_v12  ;;  %v576_v13 = vld [vmem:[%s768_s2 + $0x30] sm:$0xff]  ;;  %633 = vmatpush.bf16.msra.mxu3 %v577_v12 }
   0x5   :  { %v558_v9 = vld [vmem:[%s767_s0 + $0x20] sm:$0xff]  ;;  %v559_v11 = vld [vmem:[%s767_s0 + $0x28] sm:$0xff]  ;;  %v556_v16 = vld [vmem:[%s767_s0 + $0x10] sm:$0xff] }
   0x6   :  { %182 = vmatpush.bf16.msra.mxu0 %v568_v1  ;;  %626 = vmatpush.bf16.msra.mxu2 %v568_v1  ;;  %v575_v14 = vld [vmem:[%s768_s2 + $0x28] sm:$0xff]  ;;  %v574_v15 = vld [vmem:[%s768_s2 + $0x20] sm:$0xff]  ;;  %v560_v17 = vld [vmem:[%s767_s0 + $0x30] sm:$0xff] }
   0x7   :  { %v573_v18 = vld [vmem:[%s768_s2 + $0x18] sm:$0xff]  ;;  %v572_v21 = vld [vmem:[%s768_s2 + $0x10] sm:$0xff]  ;;  %v571_v22 = vld [vmem:[%s768_s2 + $0x8] sm:$0xff] }
   0x8   :  { %358 = vmatpush.bf16.msra.mxu1 %v576_v13  ;;  %634 = vmatpush.bf16.msra.mxu3 %v576_v13  ;;  %v557_v19 = vld [vmem:[%s767_s0 + $0x18] sm:$0xff]  ;;  %v570_v23 = vld [vmem:[%s768_s2] sm:$0xff] }
   0x9   :  { %v561_v20 = vld [vmem:[%s767_s0 + $0x38] sm:$0xff]  ;;  %v641_v49 = vld [vmem:[%s769_s3] ss:$0 sm:$0xff] }
   0xa   :  { %183 = vmatpush.bf16.msra.mxu0 %v567_v2  ;;  %627 = vmatpush.bf16.msra.mxu2 %v567_v2 }
   0xc   :  { %359 = vmatpush.bf16.msra.mxu1 %v575_v14  ;;  %635 = vmatpush.bf16.msra.mxu3 %v575_v14 }
   0xe   :  { %184 = vmatpush.bf16.msra.mxu0 %v566_v3  ;;  %628 = vmatpush.bf16.msra.mxu2 %v566_v3 }
  0x10   :  { %360 = vmatpush.bf16.msra.mxu1 %v574_v15  ;;  %636 = vmatpush.bf16.msra.mxu3 %v574_v15 }
  0x12   :  { %185 = vmatpush.bf16.msra.mxu0 %v565_v4  ;;  %629 = vmatpush.bf16.msra.mxu2 %v565_v4 }
  0x14   :  { %361 = vmatpush.bf16.msra.mxu1 %v573_v18  ;;  %637 = vmatpush.bf16.msra.mxu3 %v573_v18 }
  0x16   :  { %186 = vmatpush.bf16.msra.mxu0 %v564_v5  ;;  %630 = vmatpush.bf16.msra.mxu2 %v564_v5 }
  0x18   :  { %362 = vmatpush.bf16.msra.mxu1 %v572_v21  ;;  %638 = vmatpush.bf16.msra.mxu3 %v572_v21 }
  0x1a   :  { %187 = vmatpush.bf16.msra.mxu0 %v563_v6  ;;  %631 = vmatpush.bf16.msra.mxu2 %v563_v6 }
  0x1c   :  { %363 = vmatpush.bf16.msra.mxu1 %v571_v22  ;;  %639 = vmatpush.bf16.msra.mxu3 %v571_v22 }
  0x1e   :  { %188 = vmatpush.bf16.msra.mxu0 %v562_v7  ;;  %632 = vmatpush.bf16.msra.mxu2 %v562_v7 }
  0x20   :  { %364 = vmatpush.bf16.msra.mxu1 %v570_v23  ;;  %640 = vmatpush.bf16.msra.mxu3 %v570_v23 }
  0x21   :  { %189 = vmatmul.bf16.vlgmr.msra.gmra.mxu0 %v554_v8  ;;  %209 = vmatmul.bf16.vlgmr.msra.gmra.mxu2 %v558_v9 }
  0x31   :  { %194 = vmatmul.bf16.gmra.mxu0 %v555_v10  ;;  %214 = vmatmul.bf16.gmra.mxu2 %v559_v11 }
  0x41   :  { %199 = vmatmul.bf16.gmra.mxu0 %v556_v16  ;;  %219 = vmatmul.bf16.gmra.mxu2 %v560_v17 }
  0x51   :  { %204 = vmatmul.bf16.gmra.mxu0 %v557_v19  ;;  %224 = vmatmul.bf16.gmra.mxu2 %v561_v20 }
  0x9e   :  { %v190_v24 = vpop.f32.mrf.mxu0 }
  0xa4   :  { %v210_v25 = vpop.f32.mrf.mxu2 }
  0xa6   :  { %v192_v26 = vpop.f32.mrf.mxu0 }
  0xa7   :  { %v281_v27 = vpack.c.bf16 %v192_v26, %v190_v24 }
  0xa9   :  { %365 = vmatmul.bf16.vlgmr.msra.gmra.mxu1 %v281_v27 }
  0xac   :  { %v212_v28 = vpop.f32.mrf.mxu2 }
  0xad   :  { %v285_v29 = vpack.c.bf16 %v212_v28, %v210_v25 }
  0xae   :  { %v195_v30 = vpop.f32.mrf.mxu0 }
  0xaf   :  { %385 = vmatmul.bf16.vlgmr.msra.gmra.mxu3 %v285_v29 }
  0xb4   :  { %v215_v31 = vpop.f32.mrf.mxu2 }
  0xb6   :  { %v197_v32 = vpop.f32.mrf.mxu0 }
  0xb7   :  { %v282_v33 = vpack.c.bf16 %v197_v32, %v195_v30 }
  0xb9   :  { %370 = vmatmul.bf16.gmra.mxu1 %v282_v33 }
  0xbc   :  { %v217_v34 = vpop.f32.mrf.mxu2 }
  0xbd   :  { %v286_v35 = vpack.c.bf16 %v217_v34, %v215_v31 }
  0xbe   :  { %v200_v36 = vpop.f32.mrf.mxu0 }
  0xbf   :  { %390 = vmatmul.bf16.gmra.mxu3 %v286_v35 }
  0xc4   :  { %v220_v37 = vpop.f32.mrf.mxu2 }
  0xc6   :  { %v202_v38 = vpop.f32.mrf.mxu0 }
  0xc7   :  { %v283_v39 = vpack.c.bf16 %v202_v38, %v200_v36 }
  0xc9   :  { %375 = vmatmul.bf16.gmra.mxu1 %v283_v39 }
  0xcc   :  { %v222_v40 = vpop.f32.mrf.mxu2 }
  0xcd   :  { %v287_v41 = vpack.c.bf16 %v222_v40, %v220_v37 }
  0xce   :  { %v205_v42 = vpop.f32.mrf.mxu0 }
  0xcf   :  { %395 = vmatmul.bf16.gmra.mxu3 %v287_v41 }
  0xd4   :  { %v225_v43 = vpop.f32.mrf.mxu2 }
  0xd6   :  { %v207_v44 = vpop.f32.mrf.mxu0 }
  0xd7   :  { %v284_v45 = vpack.c.bf16 %v207_v44, %v205_v42 }
  0xd9   :  { %380 = vmatmul.bf16.gmra.mxu1 %v284_v45 }
  0xdc   :  { %v227_v46 = vpop.f32.mrf.mxu2 }
  0xdd   :  { %v288_v47 = vpack.c.bf16 %v227_v46, %v225_v43 }
  0xdf   :  { %400 = vmatmul.bf16.gmra.mxu3 %v288_v47 }
 0x126   :  { %v366_v48 = vpop.f32.mrf.mxu1 }
 0x127   :  { %v367_v50 = vadd.f32 %v641_v49, %v366_v48 }
 0x129   :  { %v406_v53 = vmax.f32 %v367_v50, 0.0 }
 0x12e   :  { %v368_v51 = vpop.f32.mrf.mxu1 }
 0x12f   :  { %v369_v52 = vadd.f32 %v641_v49, %v368_v51 }
 0x131   :  { %v407_v54 = vmax.f32 %v369_v52, 0.0 }
 0x132   :  { %v386_v55 = vpop.f32.mrf.mxu3 }
 0x133   :  { %v581_v56 = vpack.c.bf16 %v407_v54, %v406_v53  ;;  %v387_v58 = vadd.f32 %v641_v49, %v386_v55 }
 0x135   :  { %582 = vst [vmem:[%s770_s4] sm:$0xff] %v581_v56   ;;  %v414_v61 = vmax.f32 %v387_v58, 0.0 }
 0x136   :  { %v371_v57 = vpop.f32.mrf.mxu1 }
 0x137   :  { %v372_v62 = vadd.f32 %v641_v49, %v371_v57 }
 0x139   :  { %v408_v3 = vmax.f32 %v372_v62, 0.0 }
 0x13a   :  { %v388_v59 = vpop.f32.mrf.mxu3 }
 0x13b   :  { %v389_v60 = vadd.f32 %v641_v49, %v388_v59 }
 0x13d   :  { %v415_v63 = vmax.f32 %v389_v60, 0.0 }
 0x13e   :  { %v373_v0 = vpop.f32.mrf.mxu1 }
 0x13f   :  { %v601_v1 = vpack.c.bf16 %v415_v63, %v414_v61  ;;  %v374_v2 = vadd.f32 %v641_v49, %v373_v0 }
 0x141   :  { %621 = vst [vmem:[%s770_s4 + $0x20] sm:$0xff] %v601_v1   ;;  %v409_v4 = vmax.f32 %v374_v2, 0.0 }
 0x142   :  { %v391_v5 = vpop.f32.mrf.mxu3 }
 0x143   :  { %v586_v6 = vpack.c.bf16 %v409_v4, %v408_v3  ;;  %v392_v8 = vadd.f32 %v641_v49, %v391_v5 }
 0x145   :  { %618 = vst [vmem:[%s770_s4 + $0x8] sm:$0xff] %v586_v6   ;;  %v416_v11 = vmax.f32 %v392_v8, 0.0 }
 0x146   :  { %v376_v7 = vpop.f32.mrf.mxu1 }
 0x147   :  { %v377_v12 = vadd.f32 %v641_v49, %v376_v7 }
 0x149   :  { %v410_v17 = vmax.f32 %v377_v12, 0.0 }
 0x14a   :  { %v393_v9 = vpop.f32.mrf.mxu3 }
 0x14b   :  { %v394_v10 = vadd.f32 %v641_v49, %v393_v9 }
 0x14d   :  { %v417_v13 = vmax.f32 %v394_v10, 0.0 }
 0x14e   :  { %v378_v14 = vpop.f32.mrf.mxu1 }
 0x14f   :  { %v606_v15 = vpack.c.bf16 %v417_v13, %v416_v11  ;;  %v379_v16 = vadd.f32 %v641_v49, %v378_v14 }
 0x151   :  { %622 = vst [vmem:[%s770_s4 + $0x28] sm:$0xff] %v606_v15   ;;  %v411_v18 = vmax.f32 %v379_v16, 0.0 }
 0x152   :  { %v396_v19 = vpop.f32.mrf.mxu3 }
 0x153   :  { %v591_v20 = vpack.c.bf16 %v411_v18, %v410_v17  ;;  %v397_v22 = vadd.f32 %v641_v49, %v396_v19 }
 0x155   :  { %619 = vst [vmem:[%s770_s4 + $0x10] sm:$0xff] %v591_v20   ;;  %v418_v25 = vmax.f32 %v397_v22, 0.0 }
 0x156   :  { %v381_v21 = vpop.f32.mrf.mxu1 }
 0x157   :  { %v382_v26 = vadd.f32 %v641_v49, %v381_v21 }
 0x159   :  { %v412_v31 = vmax.f32 %v382_v26, 0.0 }
 0x15a   :  { %v398_v23 = vpop.f32.mrf.mxu3 }
 0x15b   :  { %v399_v24 = vadd.f32 %v641_v49, %v398_v23 }
 0x15d   :  { %v419_v27 = vmax.f32 %v399_v24, 0.0 }
 0x15e   :  { %v383_v28 = vpop.f32.mrf.mxu1 }
 0x15f   :  { %v611_v29 = vpack.c.bf16 %v419_v27, %v418_v25  ;;  %v384_v30 = vadd.f32 %v641_v49, %v383_v28 }
 0x161   :  { %623 = vst [vmem:[%s770_s4 + $0x30] sm:$0xff] %v611_v29   ;;  %v413_v32 = vmax.f32 %v384_v30, 0.0 }
 0x162   :  { %v401_v33 = vpop.f32.mrf.mxu3 }
 0x163   :  { %v596_v34 = vpack.c.bf16 %v413_v32, %v412_v31  ;;  %v402_v35 = vadd.f32 %v641_v49, %v401_v33 }
 0x165   :  { %620 = vst [vmem:[%s770_s4 + $0x18] sm:$0xff] %v596_v34   ;;  %v420_v38 = vmax.f32 %v402_v35, 0.0 }
 0x16a   :  { %v403_v36 = vpop.f32.mrf.mxu3 }
 0x16b   :  { %v404_v37 = vadd.f32 %v641_v49, %v403_v36 }
 0x16d   :  { %v421_v39 = vmax.f32 %v404_v37, 0.0 }
 0x16f   :  { %v616_v40 = vpack.c.bf16 %v421_v39, %v420_v38 }
 0x171   :  { %624 = vst [vmem:[%s770_s4 + $0x38] sm:$0xff] %v616_v40  }

// kernel: run.3
= control target key start
LH: loop header
LB: loop body
LE: loop exit
PB: predicated region body
PF: predicated region fallthrough
CT: control target
= control target key end

     0   :  { %s711_s1 = inlined_call_operand.vmem [shape: bf16[128,128], index: 1, kind: input, shape index: {}]   ;;  %s712_s0 = inlined_call_operand.vmem [shape: bf16[128,128], index: 0, kind: input, shape index: {}]   ;;  %s713_s2 = inlined_call_operand.vmem [shape: bf16[128,128], index: 2, kind: input, shape index: {}]   ;;  %s714_s3 = inlined_call_operand.vmem [shape: f32[1,128], index: 3, kind: input, shape index: {}]   ;;  %s715_s4 = inlined_call_operand.vmem [shape: f32[128,128], index: 4, kind: output, shape index: {}]  }
   0x1   :  { %v537_v0 = vld [vmem:[%s711_s1 + $0x38] sm:$0xff]  ;;  %v536_v1 = vld [vmem:[%s711_s1 + $0x30] sm:$0xff]  ;;  %v535_v2 = vld [vmem:[%s711_s1 + $0x28] sm:$0xff] }
   0x2   :  { %181 = vmatpush.bf16.msra.mxu0 %v537_v0  ;;  %546 = vmatpush.bf16.msra.mxu2 %v537_v0  ;;  %v534_v3 = vld [vmem:[%s711_s1 + $0x20] sm:$0xff]  ;;  %v533_v4 = vld [vmem:[%s711_s1 + $0x18] sm:$0xff]  ;;  %v532_v5 = vld [vmem:[%s711_s1 + $0x10] sm:$0xff] }
   0x3   :  { %v531_v6 = vld [vmem:[%s711_s1 + $0x8] sm:$0xff]  ;;  %v530_v7 = vld [vmem:[%s711_s1] sm:$0xff]  ;;  %v545_v12 = vld [vmem:[%s713_s2 + $0x38] sm:$0xff] }
   0x4   :  { %v522_v8 = vld [vmem:[%s712_s0] sm:$0xff]  ;;  %v523_v10 = vld [vmem:[%s712_s0 + $0x8] sm:$0xff]  ;;  %357 = vmatpush.bf16.msra.mxu1 %v545_v12  ;;  %v544_v13 = vld [vmem:[%s713_s2 + $0x30] sm:$0xff]  ;;  %554 = vmatpush.bf16.msra.mxu3 %v545_v12 }
   0x5   :  { %v526_v9 = vld [vmem:[%s712_s0 + $0x20] sm:$0xff]  ;;  %v527_v11 = vld [vmem:[%s712_s0 + $0x28] sm:$0xff]  ;;  %v524_v16 = vld [vmem:[%s712_s0 + $0x10] sm:$0xff] }
   0x6   :  { %182 = vmatpush.bf16.msra.mxu0 %v536_v1  ;;  %547 = vmatpush.bf16.msra.mxu2 %v536_v1  ;;  %v543_v14 = vld [vmem:[%s713_s2 + $0x28] sm:$0xff]  ;;  %v542_v15 = vld [vmem:[%s713_s2 + $0x20] sm:$0xff]  ;;  %v528_v17 = vld [vmem:[%s712_s0 + $0x30] sm:$0xff] }
   0x7   :  { %v541_v18 = vld [vmem:[%s713_s2 + $0x18] sm:$0xff]  ;;  %v540_v21 = vld [vmem:[%s713_s2 + $0x10] sm:$0xff]  ;;  %v539_v22 = vld [vmem:[%s713_s2 + $0x8] sm:$0xff] }
   0x8   :  { %358 = vmatpush.bf16.msra.mxu1 %v544_v13  ;;  %555 = vmatpush.bf16.msra.mxu3 %v544_v13  ;;  %v525_v19 = vld [vmem:[%s712_s0 + $0x18] sm:$0xff]  ;;  %v538_v23 = vld [vmem:[%s713_s2] sm:$0xff] }
   0x9   :  { %v529_v20 = vld [vmem:[%s712_s0 + $0x38] sm:$0xff]  ;;  %v562_v48 = vld [vmem:[%s714_s3] ss:$0 sm:$0xff] }
   0xa   :  { %183 = vmatpush.bf16.msra.mxu0 %v535_v2  ;;  %548 = vmatpush.bf16.msra.mxu2 %v535_v2 }
   0xc   :  { %359 = vmatpush.bf16.msra.mxu1 %v543_v14  ;;  %556 = vmatpush.bf16.msra.mxu3 %v543_v14 }
   0xe   :  { %184 = vmatpush.bf16.msra.mxu0 %v534_v3  ;;  %549 = vmatpush.bf16.msra.mxu2 %v534_v3 }
  0x10   :  { %360 = vmatpush.bf16.msra.mxu1 %v542_v15  ;;  %557 = vmatpush.bf16.msra.mxu3 %v542_v15 }
  0x12   :  { %185 = vmatpush.bf16.msra.mxu0 %v533_v4  ;;  %550 = vmatpush.bf16.msra.mxu2 %v533_v4 }
  0x14   :  { %361 = vmatpush.bf16.msra.mxu1 %v541_v18  ;;  %558 = vmatpush.bf16.msra.mxu3 %v541_v18 }
  0x16   :  { %186 = vmatpush.bf16.msra.mxu0 %v532_v5  ;;  %551 = vmatpush.bf16.msra.mxu2 %v532_v5 }
  0x18   :  { %362 = vmatpush.bf16.msra.mxu1 %v540_v21  ;;  %559 = vmatpush.bf16.msra.mxu3 %v540_v21 }
  0x1a   :  { %187 = vmatpush.bf16.msra.mxu0 %v531_v6  ;;  %552 = vmatpush.bf16.msra.mxu2 %v531_v6 }
  0x1c   :  { %363 = vmatpush.bf16.msra.mxu1 %v539_v22  ;;  %560 = vmatpush.bf16.msra.mxu3 %v539_v22 }
  0x1e   :  { %188 = vmatpush.bf16.msra.mxu0 %v530_v7  ;;  %553 = vmatpush.bf16.msra.mxu2 %v530_v7 }
  0x20   :  { %364 = vmatpush.bf16.msra.mxu1 %v538_v23  ;;  %561 = vmatpush.bf16.msra.mxu3 %v538_v23 }
  0x21   :  { %189 = vmatmul.bf16.vlgmr.msra.gmra.mxu0 %v522_v8  ;;  %209 = vmatmul.bf16.vlgmr.msra.gmra.mxu2 %v526_v9 }
  0x31   :  { %194 = vmatmul.bf16.gmra.mxu0 %v523_v10  ;;  %214 = vmatmul.bf16.gmra.mxu2 %v527_v11 }
  0x41   :  { %199 = vmatmul.bf16.gmra.mxu0 %v524_v16  ;;  %219 = vmatmul.bf16.gmra.mxu2 %v528_v17 }
  0x51   :  { %204 = vmatmul.bf16.gmra.mxu0 %v525_v19  ;;  %224 = vmatmul.bf16.gmra.mxu2 %v529_v20 }
  0x9e   :  { %v190_v24 = vpop.f32.mrf.mxu0 }
  0xa4   :  { %v210_v25 = vpop.f32.mrf.mxu2 }
  0xa6   :  { %v192_v26 = vpop.f32.mrf.mxu0 }
  0xa7   :  { %v281_v27 = vpack.c.bf16 %v192_v26, %v190_v24 }
  0xa9   :  { %365 = vmatmul.bf16.vlgmr.msra.gmra.mxu1 %v281_v27 }
  0xac   :  { %v212_v28 = vpop.f32.mrf.mxu2 }
  0xad   :  { %v285_v29 = vpack.c.bf16 %v212_v28, %v210_v25 }
  0xae   :  { %v195_v30 = vpop.f32.mrf.mxu0 }
  0xaf   :  { %385 = vmatmul.bf16.vlgmr.msra.gmra.mxu3 %v285_v29 }
  0xb4   :  { %v215_v31 = vpop.f32.mrf.mxu2 }
  0xb6   :  { %v197_v32 = vpop.f32.mrf.mxu0 }
  0xb7   :  { %v282_v33 = vpack.c.bf16 %v197_v32, %v195_v30 }
  0xb9   :  { %370 = vmatmul.bf16.gmra.mxu1 %v282_v33 }
  0xbc   :  { %v217_v34 = vpop.f32.mrf.mxu2 }
  0xbd   :  { %v286_v35 = vpack.c.bf16 %v217_v34, %v215_v31 }
  0xbe   :  { %v200_v36 = vpop.f32.mrf.mxu0 }
  0xbf   :  { %390 = vmatmul.bf16.gmra.mxu3 %v286_v35 }
  0xc4   :  { %v220_v37 = vpop.f32.mrf.mxu2 }
  0xc6   :  { %v202_v38 = vpop.f32.mrf.mxu0 }
  0xc7   :  { %v283_v39 = vpack.c.bf16 %v202_v38, %v200_v36 }
  0xc9   :  { %375 = vmatmul.bf16.gmra.mxu1 %v283_v39 }
  0xcc   :  { %v222_v40 = vpop.f32.mrf.mxu2 }
  0xcd   :  { %v287_v41 = vpack.c.bf16 %v222_v40, %v220_v37 }
  0xce   :  { %v205_v42 = vpop.f32.mrf.mxu0 }
  0xcf   :  { %395 = vmatmul.bf16.gmra.mxu3 %v287_v41 }
  0xd4   :  { %v225_v43 = vpop.f32.mrf.mxu2 }
  0xd6   :  { %v207_v44 = vpop.f32.mrf.mxu0 }
  0xd7   :  { %v284_v45 = vpack.c.bf16 %v207_v44, %v205_v42 }
  0xd9   :  { %380 = vmatmul.bf16.gmra.mxu1 %v284_v45 }
  0xdc   :  { %v227_v46 = vpop.f32.mrf.mxu2 }
  0xdd   :  { %v288_v47 = vpack.c.bf16 %v227_v46, %v225_v43 }
  0xdf   :  { %400 = vmatmul.bf16.gmra.mxu3 %v288_v47 }
 0x126   :  { %v366_v49 = vpop.f32.mrf.mxu1 }
 0x127   :  { %v367_v50 = vadd.f32 %v562_v48, %v366_v49 }
 0x129   :  { %406 = vst [vmem:[%s715_s4] sm:$0xff] %v367_v50 }
 0x12e   :  { %v368_v51 = vpop.f32.mrf.mxu1 }
 0x12f   :  { %v369_v52 = vadd.f32 %v562_v48, %v368_v51 }
 0x131   :  { %407 = vst [vmem:[%s715_s4 + $0x8] sm:$0xff] %v369_v52 }
 0x132   :  { %v386_v53 = vpop.f32.mrf.mxu3 }
 0x133   :  { %v387_v54 = vadd.f32 %v562_v48, %v386_v53 }
 0x135   :  { %414 = vst [vmem:[%s715_s4 + $0x40] sm:$0xff] %v387_v54 }
 0x136   :  { %v371_v55 = vpop.f32.mrf.mxu1 }
 0x137   :  { %v372_v56 = vadd.f32 %v562_v48, %v371_v55 }
 0x139   :  { %408 = vst [vmem:[%s715_s4 + $0x10] sm:$0xff] %v372_v56 }
 0x13a   :  { %v388_v57 = vpop.f32.mrf.mxu3 }
 0x13b   :  { %v389_v58 = vadd.f32 %v562_v48, %v388_v57 }
 0x13d   :  { %415 = vst [vmem:[%s715_s4 + $0x48] sm:$0xff] %v389_v58 }
 0x13e   :  { %v373_v59 = vpop.f32.mrf.mxu1 }
 0x13f   :  { %v374_v60 = vadd.f32 %v562_v48, %v373_v59 }
 0x141   :  { %409 = vst [vmem:[%s715_s4 + $0x18] sm:$0xff] %v374_v60 }
 0x142   :  { %v391_v61 = vpop.f32.mrf.mxu3 }
 0x143   :  { %v392_v62 = vadd.f32 %v562_v48, %v391_v61 }
 0x145   :  { %416 = vst [vmem:[%s715_s4 + $0x50] sm:$0xff] %v392_v62 }
 0x146   :  { %v376_v63 = vpop.f32.mrf.mxu1 }
 0x147   :  { %v377_v0 = vadd.f32 %v562_v48, %v376_v63 }
 0x149   :  { %410 = vst [vmem:[%s715_s4 + $0x20] sm:$0xff] %v377_v0 }
 0x14a   :  { %v393_v1 = vpop.f32.mrf.mxu3 }
 0x14b   :  { %v394_v2 = vadd.f32 %v562_v48, %v393_v1 }
 0x14d   :  { %417 = vst [vmem:[%s715_s4 + $0x58] sm:$0xff] %v394_v2 }
 0x14e   :  { %v378_v3 = vpop.f32.mrf.mxu1 }
 0x14f   :  { %v379_v4 = vadd.f32 %v562_v48, %v378_v3 }
 0x151   :  { %411 = vst [vmem:[%s715_s4 + $0x28] sm:$0xff] %v379_v4 }
 0x152   :  { %v396_v5 = vpop.f32.mrf.mxu3 }
 0x153   :  { %v397_v6 = vadd.f32 %v562_v48, %v396_v5 }
 0x155   :  { %418 = vst [vmem:[%s715_s4 + $0x60] sm:$0xff] %v397_v6 }
 0x156   :  { %v381_v7 = vpop.f32.mrf.mxu1 }
 0x157   :  { %v382_v8 = vadd.f32 %v562_v48, %v381_v7 }
 0x159   :  { %412 = vst [vmem:[%s715_s4 + $0x30] sm:$0xff] %v382_v8 }
 0x15a   :  { %v398_v9 = vpop.f32.mrf.mxu3 }
 0x15b   :  { %v399_v10 = vadd.f32 %v562_v48, %v398_v9 }
 0x15d   :  { %419 = vst [vmem:[%s715_s4 + $0x68] sm:$0xff] %v399_v10 }
 0x15e   :  { %v383_v11 = vpop.f32.mrf.mxu1 }
 0x15f   :  { %v384_v12 = vadd.f32 %v562_v48, %v383_v11 }
 0x161   :  { %413 = vst [vmem:[%s715_s4 + $0x38] sm:$0xff] %v384_v12 }
 0x162   :  { %v401_v13 = vpop.f32.mrf.mxu3 }
 0x163   :  { %v402_v14 = vadd.f32 %v562_v48, %v401_v13 }
 0x165   :  { %420 = vst [vmem:[%s715_s4 + $0x70] sm:$0xff] %v402_v14 }
 0x16a   :  { %v403_v15 = vpop.f32.mrf.mxu3 }
 0x16b   :  { %v404_v16 = vadd.f32 %v562_v48, %v403_v15 }
 0x16d   :  { %421 = vst [vmem:[%s715_s4 + $0x78] sm:$0xff] %v404_v16 }

</bundles_post_ra>
